<compile_context>
chip_gen: v5e
topology: v5e:2x2
jax: 0.10.0
libtpu: 0.0.40
codegen_flags: <defaults>
</compile_context>

<pallas_src>
import functools

import jax
import jax.numpy as jnp
from jax.experimental import pallas as pl
from jax.experimental.pallas import tpu as pltpu


def _yolo_head_kernel(anchors_ref, p_ref, o_ref, *, nG, stride, head, tl):
    """Transform the first `head` rows of one (batch, anchor, L-tile) block.

    anchors_ref: SMEM (nA, 2) float32, anchors in pixel units
                 (== anchor_vec * stride in the PyTorch module).
    p_ref:       VMEM (1, 1, head, tl) raw conv-output rows 0..head-1; lane = spatial.
    o_ref:       VMEM (1, 1, head, tl) transformed rows, lane-dense.
    """
    a = pl.program_id(1)
    lane0 = pl.program_id(2) * tl  # global flat-spatial offset of this lane tile

    ph = p_ref[0, 0, :, :].astype(jnp.float32)  # (head, tl), cast after the DMA

    # Row-id masks / spatial indices — built once per grid step (no anchor loop).
    row = jax.lax.broadcasted_iota(jnp.int32, (head, tl), 0)
    col = jax.lax.broadcasted_iota(jnp.int32, (head, tl), 1) + lane0
    is_xy = row < 2
    is_wh = jnp.logical_or(row == 2, row == 3)
    is_conf = row == 4

    # Flat index k -> (gy = k // nG, gx = k % nG) without vector integer div/rem:
    # floor((k + 0.5) / nG) is exact here (k < 2^23; the +0.5 keeps a >= 0.5/nG
    # margin to integer boundaries, far above f32 divide/rounding error).
    colf = col.astype(jnp.float32)
    gy = jnp.floor((colf + 0.5) * (1.0 / float(nG)))
    gx = colf - gy * float(nG)
    g = jnp.where(row == 0, gx, gy)  # only rows 0/1 are ever selected below

    # One exp serves exp(wh) on rows 2/3 and sigmoid = 1/(1+exp(-x)) on rows 0/1/4.
    e = jnp.exp(jnp.where(is_wh, ph, -ph))  # EUP
    sig = 1.0 / (1.0 + e)

    aw = anchors_ref[a, 0]  # pixel anchors
    ah = anchors_ref[a, 1]
    anc = jnp.where(row == 2, aw, ah)

    xy = (sig + g) * stride  # rows 0, 1
    wh = e * anc             # rows 2, 3 (exp * anchor_px)
    out = jnp.where(is_xy, xy,
                    jnp.where(is_wh, wh,
                              jnp.where(is_conf, sig, ph)))  # row 4 conf; rows >=5 raw logits
    o_ref[0, 0, :, :] = out.astype(o_ref.dtype)


def yolo_layer_forward(x, anchors, nC, img_size, *, lane_tile=512):
    """x: NCHW conv output (bs, nA*(nC+5), nG, nG); anchors: (nA, 2) in pixels.

    Returns (bs, nA*nG*nG, nC+5), matching the PyTorch YOLOLayer inference path.
    """
    bs, ch, nG, nG2 = x.shape
    assert nG == nG2
    nA = anchors.shape[0]
    C = nC + 5
    assert ch == nA * C
    L = nG * nG
    stride = float(img_size) / float(nG)
    head = min(8, C)  # sublane-aligned slab holding xy / wh / conf (+ first logits)

    # Free reshape of the contiguous NCHW tensor; no dtype cast here (the kernel
    # casts to f32 after the DMA, so bf16 conv outputs stay bf16 in HBM).
    p4 = x.reshape(bs, nA, C, L)
    anchors_f = anchors.astype(jnp.float32)

    # Lane tile: full L for small maps, else 512 (multiple of 128 -> unmasked
    # stores; uneven edge tiles are handled by Pallas).  Per-step VMEM is
    # ~2 * 2 * head*tl*4 B ~= 64 KiB -> no vmem_limit_bytes needed on any gen.
    tl = L if L <= lane_tile else lane_tile
    n_l = pl.cdiv(L, tl)

    kernel = functools.partial(_yolo_head_kernel, nG=nG, stride=stride, head=head, tl=tl)
    head_out = pl.pallas_call(
        kernel,
        out_shape=jax.ShapeDtypeStruct((bs, nA, head, L), x.dtype),
        grid=(bs, nA, n_l),
        in_specs=[
            pl.BlockSpec(memory_space=pltpu.MemorySpace.SMEM),             # anchors (scalars)
            pl.BlockSpec((1, 1, head, tl), lambda b, a, j: (b, a, 0, j)),  # head rows only
        ],
        out_specs=pl.BlockSpec((1, 1, head, tl), lambda b, a, j: (b, a, 0, j)),
        compiler_params=pltpu.CompilerParams(
            dimension_semantics=("parallel", "parallel", "parallel")),
    )(anchors_f, p4)

    # Assemble the PyTorch layout outside the kernel (review option (a)):
    # class-logit tail (rows >= head) passes straight through from the input,
    # then one XLA layout change (C, L) -> (L, C) + flatten of anchors.
    if C > head:
        full = jnp.concatenate([head_out, p4[:, :, head:, :].astype(head_out.dtype)], axis=2)
    else:
        full = head_out
    return jnp.transpose(full, (0, 1, 3, 2)).reshape(bs, nA * L, C)


def yolo_layer_ref(x, anchors, nC, img_size):
    """Pure-JAX transcription of the PyTorch YOLOLayer inference forward."""
    bs, _, nG, _ = x.shape
    nA = anchors.shape[0]
    stride = img_size / nG
    p = x.astype(jnp.float32).reshape(bs, nA, nC + 5, nG, nG).transpose(0, 1, 3, 4, 2)
    gx = jnp.tile(jnp.arange(nG)[None, :], (nG, 1)).astype(jnp.float32)  # [i,j] = j
    gy = gx.T                                                             # [i,j] = i
    grid_xy = jnp.stack([gx, gy], axis=-1)[None, None]                    # (1,1,nG,nG,2)
    anchor_wh = (anchors.astype(jnp.float32) / stride).reshape(1, nA, 1, 1, 2)
    xy = jax.nn.sigmoid(p[..., 0:2]) + grid_xy
    wh = jnp.exp(p[..., 2:4]) * anchor_wh
    conf = jax.nn.sigmoid(p[..., 4:5])
    cls = p[..., 5:]  # class scores stay raw logits in this module's inference path
    out = jnp.concatenate([xy * stride, wh * stride, conf, cls], axis=-1)
    return out.reshape(bs, -1, nC + 5)


if __name__ == "__main__":
    def _check(bs, nC, nG, img_size, anchors, key):
        nA = anchors.shape[0]
        x = jax.random.normal(key, (bs, nA * (nC + 5), nG, nG), dtype=jnp.float32)
        out = jax.block_until_ready(yolo_layer_forward(x, anchors, nC, img_size))
        ref = yolo_layer_ref(x, anchors, nC, img_size)
        assert out.shape == (bs, nA * nG * nG, nC + 5), out.shape
        assert jnp.allclose(out, ref, rtol=1e-5, atol=1e-5), "mismatch vs reference"

    key = jax.random.PRNGKey(0)
    k1, k2 = jax.random.split(key)

    # Small config: nC=3 -> C=8 (== head), nG=16 -> L=256 (single lane tile), stride=4.
    _check(2, 3, 16, 64,
           jnp.array([[10.0, 13.0], [16.0, 30.0], [33.0, 23.0]], dtype=jnp.float32), k1)

    # COCO-like config: nC=80 -> C=85 (> head, tail passthrough), nG=13 -> L=169, bs=1.
    _check(1, 80, 13, 416,
           jnp.array([[116.0, 90.0], [156.0, 198.0], [373.0, 326.0]], dtype=jnp.float32), k2)

    print("KERNEL_OK")
</pallas_src>

<mosaic_0001>
module attributes {stable_mosaic.version = 11 : i64} {
  func.func @_yolo_head_kernel(%arg0: i32, %arg1: i32, %arg2: i32, %arg3: memref<3x2xf32, #tpu.memory_space<smem>>, %arg4: memref<1x1x8x256xf32, #tpu.memory_space<vmem>>, %arg5: memref<1x1x8x256xf32, #tpu.memory_space<vmem>>) attributes {dimension_semantics = [#tpu.dimension_semantics<parallel>, #tpu.dimension_semantics<parallel>, #tpu.dimension_semantics<parallel>], iteration_bounds = array<i64: 2, 3, 1>, scalar_prefetch = 0 : i64, scratch_operands = 0 : i64, tpu.core_type = #tpu.core_type<tc>, window_params = [{transform_indices = @transform_0, window_bounds = array<i64: 3, 2>}, {transform_indices = @transform_1, window_bounds = array<i64: 1, 1, 8, 256>}, {transform_indices = @transform_2, window_bounds = array<i64: 1, 1, 8, 256>}]} {
    %c256_i32 = arith.constant 256 : i32
    %0 = arith.muli %arg2, %c256_i32 : i32
    %c0 = arith.constant 0 : index
    %c0_0 = arith.constant 0 : index
    %c0_1 = arith.constant 0 : index
    %c0_2 = arith.constant 0 : index
    %1 = vector.load %arg4[%c0, %c0_0, %c0_1, %c0_2] : memref<1x1x8x256xf32, #tpu.memory_space<vmem>>, vector<1x1x8x256xf32>
    %2 = vector.shape_cast %1 : vector<1x1x8x256xf32> to vector<8x256xf32>
    %3 = tpu.iota {dimensions = array<i32: 0>} : vector<8x256xi32>
    %4 = tpu.iota {dimensions = array<i32: 1>} : vector<8x256xi32>
    %5 = vector.broadcast %0 : i32 to vector<8x256xi32>
    %6 = arith.addi %4, %5 : vector<8x256xi32>
    %c2_i32 = arith.constant 2 : i32
    %7 = vector.broadcast %c2_i32 : i32 to vector<8x256xi32>
    %8 = arith.cmpi slt, %3, %7 : vector<8x256xi32>
    %c2_i32_3 = arith.constant 2 : i32
    %9 = vector.broadcast %c2_i32_3 : i32 to vector<8x256xi32>
    %10 = arith.cmpi eq, %3, %9 : vector<8x256xi32>
    %c3_i32 = arith.constant 3 : i32
    %11 = vector.broadcast %c3_i32 : i32 to vector<8x256xi32>
    %12 = arith.cmpi eq, %3, %11 : vector<8x256xi32>
    %13 = arith.ori %10, %12 : vector<8x256xi1>
    %c4_i32 = arith.constant 4 : i32
    %14 = vector.broadcast %c4_i32 : i32 to vector<8x256xi32>
    %15 = arith.cmpi eq, %3, %14 : vector<8x256xi32>
    %16 = arith.sitofp %6 : vector<8x256xi32> to vector<8x256xf32>
    %cst = arith.constant 5.000000e-01 : f32
    %17 = vector.broadcast %cst : f32 to vector<8x256xf32>
    %18 = arith.addf %16, %17 : vector<8x256xf32>
    %cst_4 = arith.constant 6.250000e-02 : f32
    %19 = vector.broadcast %cst_4 : f32 to vector<8x256xf32>
    %20 = arith.mulf %18, %19 : vector<8x256xf32>
    %21 = math.floor %20 : vector<8x256xf32>
    %cst_5 = arith.constant 1.600000e+01 : f32
    %22 = vector.broadcast %cst_5 : f32 to vector<8x256xf32>
    %23 = arith.mulf %21, %22 : vector<8x256xf32>
    %24 = arith.subf %16, %23 : vector<8x256xf32>
    %c0_i32 = arith.constant 0 : i32
    %25 = vector.broadcast %c0_i32 : i32 to vector<8x256xi32>
    %26 = arith.cmpi eq, %3, %25 : vector<8x256xi32>
    %27 = arith.select %26, %24, %21 : vector<8x256xi1>, vector<8x256xf32>
    %cst_6 = arith.constant 0.000000e+00 : f32
    %28 = vector.broadcast %cst_6 : f32 to vector<8x256xf32>
    %29 = arith.subf %28, %2 : vector<8x256xf32>
    %30 = arith.select %13, %2, %29 : vector<8x256xi1>, vector<8x256xf32>
    %31 = math.exp %30 : vector<8x256xf32>
    %cst_7 = arith.constant 1.000000e+00 : f32
    %32 = vector.broadcast %cst_7 : f32 to vector<8x256xf32>
    %33 = arith.addf %32, %31 : vector<8x256xf32>
    %cst_8 = arith.constant 1.000000e+00 : f32
    %34 = vector.broadcast %cst_8 : f32 to vector<8x256xf32>
    %35 = arith.divf %34, %33 : vector<8x256xf32>
    %36 = arith.index_cast %arg1 : i32 to index
    %c0_9 = arith.constant 0 : index
    %37 = memref.load %arg3[%36, %c0_9] : memref<3x2xf32, #tpu.memory_space<smem>>
    %38 = arith.index_cast %arg1 : i32 to index
    %c1 = arith.constant 1 : index
    %39 = memref.load %arg3[%38, %c1] : memref<3x2xf32, #tpu.memory_space<smem>>
    %c2_i32_10 = arith.constant 2 : i32
    %40 = vector.broadcast %c2_i32_10 : i32 to vector<8x256xi32>
    %41 = arith.cmpi eq, %3, %40 : vector<8x256xi32>
    %42 = vector.broadcast %37 : f32 to vector<8x256xf32>
    %43 = vector.broadcast %39 : f32 to vector<8x256xf32>
    %44 = arith.select %41, %42, %43 : vector<8x256xi1>, vector<8x256xf32>
    %45 = arith.addf %35, %27 : vector<8x256xf32>
    %cst_11 = arith.constant 4.000000e+00 : f32
    %46 = vector.broadcast %cst_11 : f32 to vector<8x256xf32>
    %47 = arith.mulf %45, %46 : vector<8x256xf32>
    %48 = arith.mulf %31, %44 : vector<8x256xf32>
    %49 = arith.select %15, %35, %2 : vector<8x256xi1>, vector<8x256xf32>
    %50 = arith.select %13, %48, %49 : vector<8x256xi1>, vector<8x256xf32>
    %51 = arith.select %8, %47, %50 : vector<8x256xi1>, vector<8x256xf32>
    %c0_12 = arith.constant 0 : index
    %c0_13 = arith.constant 0 : index
    %c0_14 = arith.constant 0 : index
    %c0_15 = arith.constant 0 : index
    %52 = vector.load %arg5[%c0_12, %c0_13, %c0_14, %c0_15] : memref<1x1x8x256xf32, #tpu.memory_space<vmem>>, vector<1x1x8x256xf32>
    %53 = vector.shape_cast %52 : vector<1x1x8x256xf32> to vector<8x256xf32>
    %54 = vector.shape_cast %51 : vector<8x256xf32> to vector<1x1x8x256xf32>
    tpu.vector_store %arg5[%c0_12, %c0_13, %c0_14, %c0_15], %54 {strides = array<i32>} : memref<1x1x8x256xf32, #tpu.memory_space<vmem>>, vector<1x1x8x256xf32>,
    return
  }
  func.func @transform_0(%arg0: i32, %arg1: i32, %arg2: i32) -> (i32, i32) {
    %c0_i32 = arith.constant 0 : i32
    %c0_i32_0 = arith.constant 0 : i32
    %c0_i32_1 = arith.constant 0 : i32
    return %c0_i32, %c0_i32_0 : i32, i32
  }
  func.func @transform_1(%arg0: i32, %arg1: i32, %arg2: i32) -> (i32, i32, i32, i32) {
    %c0_i32 = arith.constant 0 : i32
    %c0_i32_0 = arith.constant 0 : i32
    return %arg0, %arg1, %c0_i32, %arg2 : i32, i32, i32, i32
  }
  func.func @transform_2(%arg0: i32, %arg1: i32, %arg2: i32) -> (i32, i32, i32, i32) {
    %c0_i32 = arith.constant 0 : i32
    %c0_i32_0 = arith.constant 0 : i32
    return %arg0, %arg1, %c0_i32, %arg2 : i32, i32, i32, i32
  }
}

</mosaic_0001>

<bundles_post_ra>
// kernel: tpu_custom_call.1
= control target key start
LH: loop header
LB: loop body
LE: loop exit
PB: predicated region body
PF: predicated region fallthrough
CT: control target
= control target key end

     0   :  { %s942_s0 = inlined_call_operand.vmem [shape: f32[3,2], index: 0, kind: input, shape index: {}]   ;;  %s943_s1 = inlined_call_operand.hbm [shape: f32[2,3,8,256], index: 1, kind: input, shape index: {}]   ;;  %s944_s2 = inlined_call_operand.hbm [shape: f32[2,3,8,256], index: 2, kind: output, shape index: {}]  }
   0x1   :  { %949 = sst [smem:[#allocation15_spill]] %s942_s0 }
   0x2   :  { %7 = vsyncpa [#allocation5], 0 }
   0x3   :  { %8 = vsyncpa [#allocation3], 0 }
   0x4   :  { %10 = vsyncpa [#allocation3 + $0x1], 0 }
   0x5   :  { %11 = vsyncpa [#allocation4], 0 }
   0x6   :  { %13 = vsyncpa [#allocation4 + $0x1], 0  ;;  %s710_s9 = smov 0   ;;  %s712_s10 = smov 0  }
   0x7   :  { %s714_s11 = smov 0   ;;  %s716_s12 = smov 0  }
   0x8   :  { %s718_s13 = smov 0   ;;  %s720_s14 = smov 0  }
   0x9   :  { %s722_s15 = smov 0   ;;  %s724_s16 = smov 0  }
   0xa LB: > { %950 = sst [smem:[#allocation11_spill]] %s664_s9  ;;  %s428_s17 = sadd.s32 4294967295, %s692_s16   ;;  %s692_s16 = sphi %s724_s16, %s19_s16   ;;  %s688_s15 = sphi %s722_s15, %s977_s15   ;;  %s684_s14 = sphi %s720_s14, %s976_s14   ;;  %s680_s13 = sphi %s718_s13, %s975_s13   ;;  %s676_s12 = sphi %s716_s12, %s974_s12   ;;  %s672_s11 = sphi %s714_s11, %s973_s11   ;;  %s668_s10 = sphi %s712_s10, %s972_s10   ;;  %s664_s9 = sphi %s710_s9, %s971_s9  }
   0xb   : > { %s429_s18 = sadd.s32 4294967294, %s692_s16   ;;  %p83_p0 = scmp.ne.s32.totalorder %s668_s10, %s664_s9 }
   0xc   : > { %p754_p1 = scmp.eq.s32.totalorder %s428_s17, 0  ;;  %p117_p2 = scmp.eq.s32.totalorder %s429_s18, 5 }
   0xd   : > { %p430_p4 = scmp.ge.s32.totalorder %s692_s16, 1  ;;  %p124_p6 = scmp.lt.s32.totalorder %s692_s16, 7 }
   0xe   : > { %p760_p3 = por %p754_p1, %p83_p0  ;;  %p765_p5 = por %p117_p2, %p83_p0 }
   0xf   : > { %s955_s0 = sld [smem:[#allocation15_spill]]  ;;  %p773_p7 = pnand %p430_p4, %p124_p6 }
  0x10   : > { %s953_s21 = scalar_select %p765_p5, 1, 0 }
  0x11   : > { %p456_p8 = pneg %p773_p7  ;;  %s34_s26 = sadd.s32 1, %s684_s14 }
  0x12   : > { %954 = sst [smem:[#allocation12_spill]] %s953_s21  ;;  %s694_s27 = smov [#allocation2]  }
  0x13   : > { %p457_p9 = pnand %p456_p8, %p754_p1  ;;  %p36_p10 = scmp.ge.s32.totalorder %s34_s26, 3 }
  0x14   : > { %s38_s28 = sadd.s32 1, %s688_s15  ;;  %p111_p11 = scmp.eq.s32.totalorder %s428_s17, 5 }
  0x15   : > { %s136_s24 = sshll.u32 %s955_s0, 4  ;;  %p77_p12 = scmp.ne.s32.totalorder %s672_s11, %s668_s10  ;;  %s137_s24 = int_to_ptr.vmem [resolvable:$true] %s136_s24 }
  0x16   : > { %459 = dma.vmem_to_smem (!%p457_p9), %s137_s24, 64, %s694_s27, [#allocation5]  }
  0x17   : > { %s979_s26 = smov (%p36_p10, %s34_s26), 0  ;;  %s981_s28 = smov (!%p36_p10, %s38_s28), %s688_s15 }
  0x18   : > { %957 = sst [smem:[#allocation13_spill]] %s979_s26  ;;  %s70_s29 = sadd.s32 1, %s672_s11 }
  0x19   : > { %p78_p13 = scmp.eq.s32.totalorder %s692_s16, 0  ;;  %p40_p0 = scmp.ge.s32.totalorder %s981_s28, 2 }
  0x1a   : > { %p790_p2 = por %p111_p11, %p77_p12  ;;  %s64_s3 = ssub.s32 %s684_s14, %s979_s26 }
  0x1b   : > { %p796_p4 = por %p78_p13, %p77_p12  ;;  %s983_s28 = smov (%p40_p0, %s981_s28), 0 }
  0x1c   : > { %960 = sst [smem:[#allocation14_spill]] %s983_s28  ;;  %p469_p6 = scmp.lt.s32.totalorder %s692_s16, 6 }
  0x1d   : > { %s147_s5 = sand.u32 1, %s672_s11   ;;  %s63_s6 = ssub.s32 %s688_s15, %s983_s28 }
  0x1e   : > { %s434_s7 = sshll.u32 %s684_s14, 1  ;;  %s65_s8 = sor.u32 %s64_s3, %s63_s6 }
  0x1f   : > { %s433_s17 = sshll.u32 %s147_s5, 4  ;;  %p68_p8 = scmp.eq.s32.totalorder %s65_s8, 0 }
  0x20   : > { %s446_s18 = smul.u32 6, %s688_s15  ;;  %s151_s22 = scalar_lea.vmem [#allocation6], %s433_s17 }
  0x21   : > { %s164_s23 = sshll.u32 %s151_s22, 4  ;;  %p461_p9 = pnand %p469_p6, %p796_p4  ;;  %s165_s23 = int_to_ptr.vmem [resolvable:$true] %s164_s23 }
  0x22   : > { %s809_s24 = scalar_select %p68_p8, %s672_s11, %s70_s29  }
  0x23   : > { %s158_s27 = sadd.s32 %s446_s18, %s434_s7  ;;  %s148_s3 = scalar_lea.sflag [#allocation3], %s147_s5 }
  0x24   : > { %s435_s0 = sshll.u32 %s158_s27, 3  ;;  %173 = sbr.rel (%p773_p7) target bundleno = 92 (0x5c), region = 28 }
  0x25   : > { %s160_s9 = scalar_lea.hbm %s943_s1, %s435_s0 }
  0x26   : > { %s162_s28 = sshll.u32 %s160_s9, 4  ;;  %s163_s28 = int_to_ptr.hbm [resolvable:$true] %s162_s28 }
  0x27   : > { %463 = dma.hbm_to_vmem [thread:$0]  (!%p461_p9), %s163_s28, 256, %s165_s23, %s148_s3  }
  0x29   : > { %651 = dma.done.wait (%p754_p1), [#allocation5], 64  }
  0x2a   : > { %653 = vsyncadd (%p754_p1), [#allocation5], 4294967232  ;;  %s825_s29 = sand.u32 1, %s668_s10  }
  0x2b   : > { %s438_s0 = sshll.u32 %s825_s29, 4  ;;  %s181_s9 = scalar_lea.sflag [#allocation3], %s825_s29 }
  0x2c   : > { %s184_s21 = scalar_lea.vmem [#allocation6], %s438_s0 }
  0x2d   : > { %655 = dma.done.wait (%p760_p3), %s181_s9, 256  }
  0x2e   : > { %657 = vsyncadd (%p760_p3), %s181_s9, 4294967040 }
  0x2f   : > { %190 = sfence }
  0x30   : > { %v835_v0 = vld [vmem:[%s184_s21] sm:$0xff]  ;;  %v212_v1 = vlaneseq  ;;  %v837_v2 = vld [vmem:[%s184_s21 + $0x8] sm:$0xff]  ;;  %s440_s19 = sshll.u32 %s676_s12, 7  ;;  %s447_s28 = smul.u32 6, %s680_s13 }
  0x31   : > { %v240_v5 = vsub.f32 0.0, %v835_v0  ;;  %v241_v6 = vsub.f32 0.0, %v837_v2  ;;  %s282_s20 = sadd.s32 1, %s440_s19  ;;  %s858_s25 = sld [smem:[#allocation2 + %s440_s19]] }
  0x32   : > { %v839_v3 = vshrl.u32 %v212_v1, 7  ;;  %v215_v4 = vand.u32 127, %v212_v1  ;;  %s860_s26 = sld [smem:[#allocation2 + %s282_s20]]  ;;  %s442_s4 = sshll.u32 %s676_s12, 1 }
  0x33   : > { %s315_s5 = sadd.s32 %s447_s28, %s442_s4  ;;  %s206_s8 = scalar_lea.vmem [#allocation7], %s438_s0 }
  0x34   : > { %vm221_vm0 = vcmp.eq.s32.totalorder %v839_v3, 2  ;;  %vm222_vm1 = vcmp.eq.s32.totalorder %v839_v3, 3  ;;  %v216_v8 = vadd.s32 128, %v215_v4  ;;  %v225_v9 = vcvt.s32.f32 %v215_v4  ;;  %s443_s12 = sshll.u32 %s315_s5, 3  ;;  %s319_s17 = sshll.u32 %s206_s8, 4  ;;  %s320_s17 = int_to_ptr.vmem [resolvable:$true] %s319_s17 }
  0x35   : > { %vm847_vm2 = vmor %vm221_vm0, %vm222_vm1  ;;  %vm237_vm7 = vcmp.eq.s32.totalorder %v839_v3, 0  ;;  %vm224_vm9 = vcmp.eq.s32.totalorder %v839_v3, 4  ;;  %s317_s7 = scalar_lea.hbm %s944_s2, %s443_s12  ;;  %vm220_vm13 = vcmp.lt.s32.totalorder %v839_v3, 2  ;;  %s302_s22 = scalar_lea.sflag [#allocation4], %s825_s29 }
  0x36   : > { %v242_v10 = vsel %vm847_vm2, %v835_v0, %v240_v5  ;;  %v243_v11 = vsel %vm847_vm2, %v837_v2, %v241_v6  ;;  %v226_v14 = vcvt.s32.f32 %v216_v8  ;;  %v227_v15 = vadd.f32 0.5, %v225_v9  ;;  %s321_s18 = sshll.u32 %s317_s7, 4  ;;  %s610_s9 = scalar_lea.hbm %s944_s2, 96  ;;  %s322_s18 = int_to_ptr.hbm [resolvable:$true] %s321_s18 }
  0x37   : > { %v244_v12 = vmul.f32 1.442695, %v242_v10  ;;  %v246_v13 = vmul.f32 1.442695, %v243_v11  ;;  %v284_v29 = vstv %s858_s25  ;;  %s604_s23 = sshra.s32 %s322_s18, 4  ;;  %s605_s23 = int_to_ptr.hbm [resolvable:$true] %s604_s23 }
  0x38   : > { %v228_v16 = vadd.f32 0.5, %v226_v14  ;;  %v229_v17 = vmul.f32 0.0625, %v227_v15  ;;  %v285_v30 = vstv %s860_s26  ;;  %s606_s27 = scalar_lea.hbm %s605_s23, 16  ;;  %p611_p10 = scmp.lt.s32.totalorder %s605_s23, %s944_s2 }
  0x39   : > { %537 = vpow2.f32 %v244_v12  ;;  %v286_v41 = vsel %vm221_vm0, %v284_v29, %v285_v30  ;;  %p607_p1 = scmp.ne.s32.totalorder %s605_s23, %s606_s27  ;;  %p612_p11 = scmp.lt.s32.totalorder %s610_s9, %s606_s27 }
  0x3a   : > { %539 = vpow2.f32 %v246_v13  ;;  %v230_v21 = vmul.f32 0.0625, %v228_v16  ;;  %v231_v23 = vfloor.f32 %v229_v17 }
  0x3b   : > { %p608_p3 = pnand %p607_p1, %p790_p2  ;;  %p613_p12 = por %p612_p11, %p611_p10 }
  0x3c   : > { %v232_v24 = vfloor.f32 %v230_v21  ;;  %v233_v25 = vmul.f32 16.0, %v231_v23 }
  0x3d   : > { %p609_p7 = pneg %p608_p3 }
  0x3e   : > { %v234_v31 = vmul.f32 16.0, %v232_v24  ;;  %v235_v32 = vsub.f32 %v225_v9, %v233_v25 }
  0x3f   : > { %v538_v18 = vpop.eup %537  ;;  %p614_p13 = pnand %p613_p12, %p609_p7 }
  0x40   : > { %v540_v19 = vpop.eup %539  ;;  %v248_v20 = vadd.f32 1.0, %v538_v18  ;;  %v236_v42 = vsub.f32 %v226_v14, %v234_v31  ;;  %v238_v49 = vsel %vm237_vm7, %v235_v32, %v231_v23  ;;  %v291_v50 = vmul.f32 %v538_v18, %v286_v41 }
  0x41   : > { %v249_v22 = vadd.f32 1.0, %v540_v19  ;;  %v292_v54 = vmul.f32 %v540_v19, %v286_v41 }
  0x42   : > { %541 = vrcp.f32 %v248_v20  ;;  %vm255_vm3 = vweird.f32 %v248_v20  ;;  %v261_v33 = vand.u32 2147483648, %v248_v20  ;;  %v259_v36 = vand.u32 2147483647, %v248_v20 }
  0x43   : > { %543 = vrcp.f32 %v249_v22  ;;  %v276_v37 = vand.u32 2147483648, %v249_v22  ;;  %vm270_vm5 = vweird.f32 %v249_v22  ;;  %v274_v39 = vand.u32 2147483647, %v249_v22 }
  0x44   : > { %v262_v44 = vor.u32 1.1754944e-38, %v261_v33  ;;  %vm260_vm10 = vcmp.eq.f32.partialorder %v259_v36, 8.507059e+37  ;;  %v239_v53 = vsel %vm237_vm7, %v236_v42, %v232_v24 }
  0x45   : > { %v277_v48 = vor.u32 1.1754944e-38, %v276_v37  ;;  %vm275_vm12 = vcmp.eq.f32.partialorder %v274_v39, 8.507059e+37 }
  0x48   : > { %v542_v26 = vpop.eup %541 }
  0x49   : > { %v544_v27 = vpop.eup %543  ;;  %v251_v28 = vmul.f32 %v542_v26, %v248_v20  ;;  %vm256_vm4 = vweird.f32 %v542_v26 }
  0x4a   : > { %v266_v34 = vmul.f32 %v544_v27, %v249_v22  ;;  %vm271_vm6 = vweird.f32 %v544_v27  ;;  %vm870_vm8 = vmor %vm255_vm3, %vm256_vm4 }
  0x4b   : > { %v252_v35 = vsub.f32 1.0, %v251_v28  ;;  %vm875_vm11 = vmor %vm270_vm5, %vm271_vm6 }
  0x4c   : > { %v267_v38 = vsub.f32 1.0, %v266_v34 }
  0x4d   : > { %v253_v40 = vmul.f32 %v542_v26, %v252_v35 }
  0x4e   : > { %v268_v45 = vmul.f32 %v544_v27, %v267_v38 }
  0x4f   : > { %v254_v46 = vadd.f32 %v542_v26, %v253_v40 }
  0x50   : > { %v269_v51 = vadd.f32 %v544_v27, %v268_v45 }
  0x51   : > { %v258_v52 = vsel %vm870_vm8, %v542_v26, %v254_v46 }
  0x52   : > { %v263_v55 = vsel %vm260_vm10, %v262_v44, %v258_v52  ;;  %v273_v56 = vsel %vm875_vm11, %v544_v27, %v269_v51 }
  0x53   : > { %v287_v57 = vadd.f32 %v263_v55, %v238_v49  ;;  %v293_v58 = vsel %vm224_vm9, %v263_v55, %v835_v0  ;;  %v278_v59 = vsel %vm275_vm12, %v277_v48, %v273_v56 }
  0x54   : > { %v295_v60 = vsel %vm847_vm2, %v291_v50, %v293_v58  ;;  %v288_v61 = vadd.f32 %v278_v59, %v239_v53  ;;  %v294_v62 = vsel %vm224_vm9, %v278_v59, %v837_v2 }
  0x55   : > { %v289_v63 = vmul.f32 4.0, %v287_v57  ;;  %v296_v0 = vsel %vm847_vm2, %v292_v54, %v294_v62 }
  0x56   : > { %v290_v1 = vmul.f32 4.0, %v288_v61 }
  0x57   : > { %v297_v4 = vsel %vm220_vm13, %v289_v63, %v295_v60 }
  0x58   : > { %299 = vst [vmem:[%s206_s8] sm:$0xff] %v297_v4  ;;  %v298_v5 = vsel %vm220_vm13, %v290_v1, %v296_v0 }
  0x59   : > { %300 = vst [vmem:[%s206_s8 + $0x8] sm:$0xff] %v298_v5 }
  0x5a   : > { %617 = shalt.err (!%p614_p13)
}
  0x5b   : > { %454 = dma.vmem_to_hbm [thread:$0]  (%p790_p2), %s320_s17, 256, %s322_s18, %s302_s22  }
  0x5c PF: > { %s967_s29 = sld [smem:[#allocation11_spill]]  ;;  %p471_p0 = scmp.ge.s32.totalorder %s692_s16, 2 }
  0x5e   : > { %p465_p4 = pnand %p471_p0, %p765_p5 }
  0x60   : > { %p466_p6 = pneg %p465_p4 }
  0x62   : > { %s333_s25 = sand.u32 1, %s967_s29  }
  0x63   : > { %s334_s26 = scalar_lea.sflag [#allocation4], %s333_s25 }
  0x64   : > { %659 = dma.done.wait (%p466_p6), %s334_s26, 256  }
  0x65   : > { %661 = vsyncadd (%p466_p6), %s334_s26, 4294967040  ;;  %s19_s16 = sadd.s32 1, %s692_s16   ;;  %s969_s30 = sld [smem:[#allocation13_spill]] }
  0x66   : > { %p16_p8 = scmp.ge.s32.totalorder %s19_s16, 8   ;;  %s970_s28 = sld [smem:[#allocation14_spill]] }
  0x67   : > { %s971_s9 = smov %s668_s10  ;;  %s972_s10 = smov %s672_s11 }
  0x68   : > { %s973_s11 = smov %s809_s24  ;;  %s974_s12 = smov %s684_s14 }
  0x69   : > { %s975_s13 = smov %s688_s15  ;;  %18 = sbr.rel (!%p16_p8) target bundleno = 10 (0xa), region = 78 }
  0x6b   : > { %s976_s14 = smov %s969_s30 }
  0x6c   : > { %s977_s15 = smov %s970_s28 }
  0x6e   :  { %340 = vsyncpa [#allocation3], 1 }
  0x6f   :  { %342 = vsyncpa [#allocation3 + $0x1], 1 }
  0x70   :  { %343 = vsyncpa [#allocation4], 1 }
  0x71   :  { %345 = vsyncpa [#allocation4 + $0x1], 1 }
  0x72   :  { %346 = vsyncpa [#allocation5], 1 }
  0x73   :  { %348 = vsyncpa [#allocation5 + $0x1], 1 }

</bundles_post_ra>
